<compile_context>
chip_gen: v7x
topology: tpu7x:2x2x1
jax: 0.10.0
libtpu: 0.0.40
codegen_flags: <defaults>
</compile_context>

<pallas_src>
import functools

import jax
import jax.numpy as jnp
import numpy as np
from jax.experimental import pallas as pl
from jax.experimental.pallas import tpu as pltpu


# ---------------------------------------------------------------------------
# Kernels
# ---------------------------------------------------------------------------
def _attack_norm_kernel(attack_ref, mean_ref, std_ref, o_ref):
    # attack_ref / o_ref: (C, W*L*8); mean_ref / std_ref: (C, 1)
    a = jnp.clip(attack_ref[...], 0.0, 1.0)
    o_ref[...] = (a - mean_ref[...]) / std_ref[...]


def _composite_kernel(x_ref, frame_ref, o_ref, *, width, side):
    # x_ref / o_ref: (TB, C, S*S); frame_ref: (C, S*S)
    # Static frame geometry -> compute the interior mask in-kernel (free on
    # the VPU; the kernel is DMA-bound).
    idx = jax.lax.broadcasted_iota(jnp.int32, (1, 1, side * side), 2)
    row = idx // side
    col = idx % side
    interior = ((row >= width) & (row < side - width)
                & (col >= width) & (col < side - width))
    x = x_ref[...]
    f = frame_ref[...][None]          # (1, C, S*S), broadcast over the batch tile
    o_ref[...] = jnp.where(interior, x, f)


# ---------------------------------------------------------------------------
# Pallas wrappers
# ---------------------------------------------------------------------------
def _normalize_attack(attack, mean, std, do_normalize=True):
    C, W, L, K = attack.shape
    N = W * L * K
    attack2d = attack.reshape(C, N)
    if do_normalize:
        mean2d = mean.reshape(C, 1).astype(attack.dtype)
        std2d = std.reshape(C, 1).astype(attack.dtype)
    else:
        mean2d = jnp.zeros((C, 1), dtype=attack.dtype)
        std2d = jnp.ones((C, 1), dtype=attack.dtype)

    out2d = pl.pallas_call(
        _attack_norm_kernel,
        out_shape=jax.ShapeDtypeStruct((C, N), attack.dtype),
        grid=(1,),
        in_specs=[
            pl.BlockSpec((C, N), lambda i: (0, 0)),
            pl.BlockSpec((C, 1), lambda i: (0, 0)),
            pl.BlockSpec((C, 1), lambda i: (0, 0)),
        ],
        out_specs=pl.BlockSpec((C, N), lambda i: (0, 0)),
    )(attack2d, mean2d, std2d)
    return out2d.reshape(C, W, L, K)


def _choose_batch_tile(B, C, P, itemsize):
    # Per-step x-block budget (~2 MiB of *padded* VMEM).  Double-buffered
    # in + out -> <= ~8 MiB, safely under the default scoped VMEM limit on
    # every generation (16 MiB on v5e, 32 MiB on v6e/v7x).
    c_padded = ((C + 7) // 8) * 8           # sublane padding of the C dim
    img_bytes = c_padded * P * itemsize
    budget = 2 << 20
    tb = max(1, min(B, budget // max(img_bytes, 1)))
    # Keep >= 2 grid steps when possible so both v7x TensorCores get work.
    if B > 1 and tb >= B:
        tb = max(1, B // 2)
    # Avoid ragged leading blocks.
    while B % tb != 0:
        tb -= 1
    return tb


def _composite(x4, frame, width):
    B, C, S, _ = x4.shape
    P = S * S
    xf = x4.reshape(B, C, P)          # lane-dense last dim
    ff = frame.reshape(C, P)

    tb = _choose_batch_tile(B, C, P, x4.dtype.itemsize)
    grid = (B // tb,)

    kernel = functools.partial(_composite_kernel, width=width, side=S)
    out = pl.pallas_call(
        kernel,
        out_shape=jax.ShapeDtypeStruct((B, C, P), x4.dtype),
        grid=grid,
        in_specs=[
            pl.BlockSpec((tb, C, P), lambda b: (b, 0, 0)),
            # constant index map -> frame is DMA'd once and stays VMEM-resident
            pl.BlockSpec((C, P), lambda b: (0, 0)),
        ],
        out_specs=pl.BlockSpec((tb, C, P), lambda b: (b, 0, 0)),
        compiler_params=pltpu.CompilerParams(dimension_semantics=("parallel",)),
    )(xf, ff)
    return out.reshape(B, C, S, S)


# ---------------------------------------------------------------------------
# Forward (matches Framing.forward with keep_size=True)
# ---------------------------------------------------------------------------
def framing_forward(x, attack_param, width, mean, std, do_normalize=True):
    C, W, L, _ = attack_param.shape
    S = L + W  # image_side_length (keep_size=True)
    assert x.shape[-1] == S and x.shape[-2] == S, (
        f"input spatial size {x.shape[-2:]} must equal (length+width)={S}")

    # 1) clamp + normalize the attack parameter (small Pallas kernel)
    attack = _normalize_attack(attack_param, mean, std, do_normalize)

    # 2) build the frame overlay (glue indexing; the 4 strips are disjoint, so
    #    write order matches PyTorch trivially)
    frame = jnp.zeros((C, S, S), dtype=x.dtype)
    frame = frame.at[:, :W, : S - W].set(attack[..., 0].astype(x.dtype))
    frame = frame.at[:, : S - W, S - W:].set(jnp.swapaxes(attack[..., 1], 1, 2).astype(x.dtype))
    frame = frame.at[:, S - W:, W:].set(attack[..., 2].astype(x.dtype))
    frame = frame.at[:, W:, :W].set(jnp.swapaxes(attack[..., 3], 1, 2).astype(x.dtype))

    # 3) composite onto the input (Pallas kernel, batched lane-dense tiles)
    orig_ndim = x.ndim
    if orig_ndim == 5:
        B, Cc, T, H, Wd = x.shape
        x4 = jnp.transpose(x, (0, 2, 1, 3, 4)).reshape(-1, Cc, H, Wd)
    else:
        x4 = x

    out4 = _composite(x4, frame, W)

    if orig_ndim == 5:
        B, Cc, T, H, Wd = x.shape
        out = jnp.transpose(out4.reshape(B, T, Cc, H, Wd), (0, 2, 1, 3, 4))
    else:
        out = out4

    return out, attack


# ---------------------------------------------------------------------------
# Pure-JAX reference (mirrors the PyTorch code exactly)
# ---------------------------------------------------------------------------
def _ref_forward(x, attack_param, width, mean, std, do_normalize=True):
    C = attack_param.shape[0]
    a = jnp.clip(attack_param, 0.0, 1.0)
    if do_normalize:
        a = (a - mean.reshape(C, 1, 1, 1)) / std.reshape(C, 1, 1, 1)
    S = x.shape[-1]
    W = width
    f = x
    f = f.at[..., :W, : S - W].set(a[..., 0])
    f = f.at[..., : S - W, S - W:].set(jnp.swapaxes(a[..., 1], 1, 2))
    f = f.at[..., S - W:, W:].set(a[..., 2])
    f = f.at[..., W:, :W].set(jnp.swapaxes(a[..., 3], 1, 2))
    return f, a


# ---------------------------------------------------------------------------
if __name__ == "__main__":
    key = jax.random.PRNGKey(0)
    k1, k2 = jax.random.split(key)

    width = 2
    image_side_length = 16
    length = image_side_length - width  # keep_size=True
    B, C = 2, 3

    # TODO(synk): original init copies strips from a dataset background image
    # (file I/O); we use deterministic random values instead.
    attack_param = jax.random.normal(k1, (C, width, length, 8), dtype=jnp.float32)
    x = jax.random.uniform(k2, (B, C, image_side_length, image_side_length), dtype=jnp.float32)

    # Deterministic per-channel normalize (ImageNet mean/std).
    mean = jnp.array([0.485, 0.456, 0.406], dtype=jnp.float32)
    std = jnp.array([0.229, 0.224, 0.225], dtype=jnp.float32)

    framed, attack_out = framing_forward(x, attack_param, width, mean, std, do_normalize=True)
    framed = jax.block_until_ready(framed)
    attack_out = jax.block_until_ready(attack_out)

    framed_ref, attack_ref = _ref_forward(x, attack_param, width, mean, std, do_normalize=True)

    assert framed.shape == x.shape
    assert attack_out.shape == attack_param.shape
    np.testing.assert_allclose(np.asarray(framed), np.asarray(framed_ref), rtol=1e-5, atol=1e-5)
    np.testing.assert_allclose(np.asarray(attack_out), np.asarray(attack_ref), rtol=1e-5, atol=1e-5)

    print("KERNEL_OK")
</pallas_src>

<mosaic_0001>
module attributes {stable_mosaic.version = 11 : i64} {
  func.func @_attack_norm_kernel(%arg0: i32, %arg1: memref<3x224xf32, #tpu.memory_space<vmem>>, %arg2: memref<3x1xf32, #tpu.memory_space<vmem>>, %arg3: memref<3x1xf32, #tpu.memory_space<vmem>>, %arg4: memref<3x224xf32, #tpu.memory_space<vmem>>) attributes {dimension_semantics = [#tpu.dimension_semantics<arbitrary>], iteration_bounds = array<i64: 1>, scalar_prefetch = 0 : i64, scratch_operands = 0 : i64, tpu.core_type = #tpu.core_type<tc>, window_params = [{pipeline_mode = #tpu.pipeline_mode<synchronous>, transform_indices = @transform_0, window_bounds = array<i64: 3, 224>}, {pipeline_mode = #tpu.pipeline_mode<synchronous>, transform_indices = @transform_1, window_bounds = array<i64: 3, 1>}, {pipeline_mode = #tpu.pipeline_mode<synchronous>, transform_indices = @transform_2, window_bounds = array<i64: 3, 1>}, {pipeline_mode = #tpu.pipeline_mode<synchronous>, transform_indices = @transform_3, window_bounds = array<i64: 3, 224>}]} {
    %c0 = arith.constant 0 : index
    %c0_0 = arith.constant 0 : index
    %0 = vector.load %arg1[%c0, %c0_0] : memref<3x224xf32, #tpu.memory_space<vmem>>, vector<3x224xf32>
    %cst = arith.constant 0.000000e+00 : f32
    %cst_1 = arith.constant 1.000000e+00 : f32
    %1 = vector.broadcast %cst : f32 to vector<3x224xf32>
    %2 = arith.maximumf %1, %0 : vector<3x224xf32>
    %3 = vector.broadcast %cst_1 : f32 to vector<3x224xf32>
    %4 = arith.minimumf %3, %2 : vector<3x224xf32>
    %c0_2 = arith.constant 0 : index
    %c0_3 = arith.constant 0 : index
    %5 = vector.load %arg2[%c0_2, %c0_3] : memref<3x1xf32, #tpu.memory_space<vmem>>, vector<3x1xf32>
    %6 = vector.broadcast %5 : vector<3x1xf32> to vector<3x224xf32>
    %7 = arith.subf %4, %6 : vector<3x224xf32>
    %c0_4 = arith.constant 0 : index
    %c0_5 = arith.constant 0 : index
    %8 = vector.load %arg3[%c0_4, %c0_5] : memref<3x1xf32, #tpu.memory_space<vmem>>, vector<3x1xf32>
    %9 = vector.broadcast %8 : vector<3x1xf32> to vector<3x224xf32>
    %10 = arith.divf %7, %9 : vector<3x224xf32>
    %c0_6 = arith.constant 0 : index
    %c0_7 = arith.constant 0 : index
    %11 = vector.load %arg4[%c0_6, %c0_7] : memref<3x224xf32, #tpu.memory_space<vmem>>, vector<3x224xf32>
    tpu.vector_store %arg4[%c0_6, %c0_7], %10 {strides = array<i32>} : memref<3x224xf32, #tpu.memory_space<vmem>>, vector<3x224xf32>,
    return
  }
  func.func @transform_0(%arg0: i32) -> (i32, i32) {
    %c0_i32 = arith.constant 0 : i32
    %c0_i32_0 = arith.constant 0 : i32
    %c0_i32_1 = arith.constant 0 : i32
    return %c0_i32, %c0_i32_0 : i32, i32
  }
  func.func @transform_1(%arg0: i32) -> (i32, i32) {
    %c0_i32 = arith.constant 0 : i32
    %c0_i32_0 = arith.constant 0 : i32
    %c0_i32_1 = arith.constant 0 : i32
    return %c0_i32, %c0_i32_0 : i32, i32
  }
  func.func @transform_2(%arg0: i32) -> (i32, i32) {
    %c0_i32 = arith.constant 0 : i32
    %c0_i32_0 = arith.constant 0 : i32
    %c0_i32_1 = arith.constant 0 : i32
    return %c0_i32, %c0_i32_0 : i32, i32
  }
  func.func @transform_3(%arg0: i32) -> (i32, i32) {
    %c0_i32 = arith.constant 0 : i32
    %c0_i32_0 = arith.constant 0 : i32
    %c0_i32_1 = arith.constant 0 : i32
    return %c0_i32, %c0_i32_0 : i32, i32
  }
}

</mosaic_0001>

<bundles_post_ra>
// kernel: tpu_custom_call.1
= control target key start
LH: loop header
LB: loop body
LE: loop exit
PB: predicated region body
PF: predicated region fallthrough
CT: control target
= control target key end

     0   :  { %v95_v1 = vmov 0   ;;  %s139_s0 = inlined_call_operand.vmem [shape: f32[3,224], index: 0, kind: input, shape index: {}]   ;;  %s140_s1 = inlined_call_operand.vmem [shape: f32[3,1], index: 1, kind: input, shape index: {}]   ;;  %s141_s2 = inlined_call_operand.vmem [shape: f32[3,1], index: 2, kind: input, shape index: {}]   ;;  %s142_s3 = inlined_call_operand.hbm [shape: f32[3,224], index: 3, kind: output, shape index: {}]  }
   0x1   :  { %v32_v0 = vld [vmem:[%s141_s2] sm:$0x7]  ;;  %68 = vset.pattern.permute.xlu0 %v95_v1 }
   0x2   :  { %8 = vsyncpa [#allocation3], 0  ;;  %35 = vperm.xlu0 %68, %v32_v0   ;;  %v18_v2 = vld [vmem:[%s140_s1] sm:$0x7]  ;;  %v96_v3 = vmov 839922192   ;;  %v26_v5 = vlaneseq }
   0x3   :  { %v24_v4 = vunpack.c.l.s4 %v96_v3  ;;  %v15_v11 = vld [vmem:[%s139_s0] sm:$0x77]  ;;  %vm47_vm0 = vcmask 1042432   ;;  %vm48_vm1 = vcmask 784388   ;;  %s97_s1 = smov [#allocation2]  }
   0x4   :  { %v27_v7 = vshrl.u32 %v26_v5, 7  ;;  %v16_v12 = vmax.f32 %v15_v11, 0.0  ;;  %s57_s2 = sshll.u32 %s97_s1, 4  ;;  %vm49_vm2 = vmor %vm48_vm1, %vm47_vm0  ;;  %s58_s2 = int_to_ptr.vmem [resolvable:$true] %s57_s2 }
   0x5   :  { %v25_v6 = vunpack.c.0.s8 %v24_v4  ;;  %s71_s18 = scalar_lea.vmem %s58_s2, 128  ;;  %p76_p1 = scmp.lt.s32.totalorder %s58_s2, %s58_s2 }
   0x6   :  { %21 = vperm.xlu0 %68, %v18_v2   ;;  %v17_v14 = vmin.f32 %v16_v12, 1.0  ;;  %p72_p0 = scmp.ne.s32.totalorder %s58_s2, %s71_s18  ;;  %p77_p2 = scmp.lt.s32.totalorder %s71_s18, %s71_s18 }
   0x7   :  { %v28_v8 = vsub.s32 %v25_v6, %v27_v7 }
   0x8   :  { %p78_p3 = por %p77_p2, %p76_p1 }
   0xa   :  { %p79_p4 = pnand %p78_p3, %p72_p0 }
  0x81   :  { %v36_v9 = vpop.permute.xlu0 %35 }
  0x82   :  { %v43_v10 = vrot.slane %v36_v9, %v28_v8 }
  0x84   :  { %69 = vrcp.f32 %v43_v10 }
  0x85   :  { %v22_v13 = vpop.permute.xlu0 %21 }
  0x86   :  { %v29_v15 = vrot.slane %v22_v13, %v28_v8 }
  0x88   :  { %v31_v16 = vsub.f32 %v17_v14, %v29_v15 }
  0x8e   :  { %v70_v17 = vpop.eup %69 }
  0x8f   :  { %v46_v18 = vmul.f32 %v70_v17, %v31_v16 }
  0x91   :  { %50 = vst.msk [vmem:[#allocation2] sm:$0x77] %vm49_vm2, %v46_v18 }
  0x92   :  { %82 = shalt.err (!%p79_p4)
}
  0x93   :  { %s83_s20 = scalar_lea.hbm %s142_s3, 128 }
  0x94   :  { %p84_p5 = scmp.ne.s32.totalorder %s142_s3, %s83_s20  ;;  %p87_p6 = scmp.lt.u32.totalorder %s83_s20, %s142_s3 }
  0x96   :  { %p89_p7 = pnand %p87_p6, %p84_p5 }
  0x98   :  { %92 = shalt.err (!%p89_p7)
}
  0x99   :  { %60 = dma.vmem_to_hbm [thread:$0]  %s58_s2, 128, %s142_s3, [#allocation3]  }
  0x9a   :  { %93 = dma.done.wait [#allocation3], 128  }
  0x9b   :  { %94 = vsyncadd [#allocation3], 4294967168 }
  0x9c   :  { %64 = vsyncpa [#allocation3], 1 }

</bundles_post_ra>
